<compile_context>
chip_gen: v5e
topology: v5e:2x2
jax: 0.10.0
libtpu: 0.0.40
codegen_flags: <defaults>
</compile_context>

<pallas_src>
import jax
import jax.numpy as jnp
from jax.experimental import pallas as pl
from jax.experimental.pallas import tpu as pltpu

ALPHA = 0.3

LANES = 128
SUBLANES = 8
MAX_BLOCK_ROWS = 4096        # (4096,128) f32 = 2 MiB per input block
NUM_PARALLEL = 2             # v7x megacore split; harmless (serial) on v5e/v6e


def _make_kernel(block_rows, blocks_per_core, rows, needs_mask):
    """Build kernel accumulating sum((x-labels)^2), sum((sp-x)^2) as (8,128)."""

    def kernel(x_ref, lab_ref, sp_ref, base_ref, rec_ref):
        j = pl.program_id(1)  # reduction ("arbitrary") axis

        @pl.when(j == 0)
        def _():
            base_ref[...] = jnp.zeros_like(base_ref)
            rec_ref[...] = jnp.zeros_like(rec_ref)

        xv = x_ref[...].astype(jnp.float32)
        lv = lab_ref[...].astype(jnp.float32)
        sv = sp_ref[...].astype(jnp.float32)

        d_base = xv - lv        # baseLoss(x, labels) residual
        d_rec = sv - xv         # baseLoss(studentPrediction, x) residual

        if needs_mask:
            # Ragged trailing block (or redundant clamped block on the last
            # core): zero rows past the true row count.  Pure VPU selects;
            # the kernel is HBM-bound so this costs nothing.
            blk = pl.program_id(0) * blocks_per_core + j
            valid = rows - blk * block_rows
            row_ids = jax.lax.broadcasted_iota(jnp.int32, (block_rows, LANES), 0)
            m = row_ids < valid
            d_base = jnp.where(m, d_base, 0.0)
            d_rec = jnp.where(m, d_rec, 0.0)

        sq_base = d_base * d_base
        sq_rec = d_rec * d_rec

        # (block_rows,128) -> (block_rows//8, 8, 128); reduce over the leading
        # axis.  vreg-wise VPU adds only; the cross-lane collapse happens once
        # in the wrapper epilogue.
        base_ref[...] += jnp.sum(sq_base.reshape(-1, SUBLANES, LANES), axis=0)
        rec_ref[...] += jnp.sum(sq_rec.reshape(-1, SUBLANES, LANES), axis=0)

    return kernel


def upper_bound_teacher_loss(x, labels, student_pred, student_loss, alpha=ALPHA):
    """x, labels, student_pred: same shape (any, e.g. NCHW). student_loss: scalar."""
    total = x.size
    pad_unit = SUBLANES * LANES                       # 1024
    padded_total = pl.cdiv(total, pad_unit) * pad_unit
    rows = padded_total // LANES                      # multiple of 8, >= 8

    def _prep(a):
        # Keep native dtype (bf16 stays bf16 -> half the HBM read bytes);
        # widen to f32 inside the kernel.  Zero-pad (a copy) ONLY when numel
        # is not already 8*128-aligned; zeros add 0 to both squared-error
        # sums and we divide by the true element count below.
        flat = a.reshape(-1)
        if padded_total != total:
            flat = jnp.pad(flat, (0, padded_total - total))
        return flat.reshape(rows, LANES)

    x2, l2, s2 = _prep(x), _prep(labels), _prep(student_pred)

    block_rows = min(MAX_BLOCK_ROWS, rows)            # multiple of 8
    total_blocks = pl.cdiv(rows, block_rows)
    p = min(NUM_PARALLEL, total_blocks)
    blocks_per_core = pl.cdiv(total_blocks, p)
    needs_mask = (p * blocks_per_core * block_rows != rows)

    if p * blocks_per_core == total_blocks:
        def in_map(pi, j):
            return (pi * blocks_per_core + j, 0)
    else:
        # Last core has fewer real blocks than the grid extent: clamp to the
        # final valid block (re-read, fully masked out in the kernel) instead
        # of issuing an out-of-bounds DMA.
        def in_map(pi, j):
            return (jnp.minimum(pi * blocks_per_core + j, total_blocks - 1), 0)

    in_spec = pl.BlockSpec((block_rows, LANES), in_map)
    out_spec = pl.BlockSpec((SUBLANES, LANES), lambda pi, j: (pi, 0))

    kernel = _make_kernel(block_rows, blocks_per_core, rows, needs_mask)

    base_p, rec_p = pl.pallas_call(
        kernel,
        out_shape=(jax.ShapeDtypeStruct((p * SUBLANES, LANES), jnp.float32),
                   jax.ShapeDtypeStruct((p * SUBLANES, LANES), jnp.float32)),
        grid_spec=pltpu.PrefetchScalarGridSpec(
            num_scalar_prefetch=0,
            grid=(p, blocks_per_core),
            in_specs=[in_spec, in_spec, in_spec],
            out_specs=[out_spec, out_spec],
        ),
        compiler_params=pltpu.CompilerParams(
            dimension_semantics=("parallel", "arbitrary"),
            vmem_limit_bytes=32 * 1024 * 1024),
    )(x2, l2, s2)

    # Tiny epilogue (2 x p*8*128 f32): collapse partials, upper-bound branch.
    base_mse = jnp.sum(base_p) / total    # mse(x, labels)
    rec_mse = jnp.sum(rec_p) / total      # mse(studentPrediction, x)
    sl = jnp.asarray(student_loss, jnp.float32)
    blended = (1.0 - alpha) * sl + alpha * rec_mse
    return jnp.where(sl > base_mse, blended, sl)


def _reference(x, labels, student_pred, student_loss, alpha=ALPHA):
    x = x.astype(jnp.float32)
    labels = labels.astype(jnp.float32)
    student_pred = student_pred.astype(jnp.float32)
    base = jnp.mean((x - labels) ** 2)
    recon = jnp.mean((student_pred - x) ** 2)
    return jnp.where(student_loss > base,
                     (1.0 - alpha) * student_loss + alpha * recon,
                     student_loss)


if __name__ == "__main__":
    key = jax.random.PRNGKey(0)
    ks = jax.random.split(key, 10)

    B, C, H, W = 2, 4, 16, 16
    x = jax.random.normal(ks[0], (B, C, H, W), jnp.float32)
    labels = jax.random.normal(ks[1], (B, C, H, W), jnp.float32)
    student_pred = jax.random.normal(ks[2], (B, C, H, W), jnp.float32)
    # exercise the "exceeds upper bound" branch
    student_loss = jnp.abs(jax.random.normal(ks[3], (), jnp.float32)) + 2.0

    got = jax.block_until_ready(
        upper_bound_teacher_loss(x, labels, student_pred, student_loss))
    want = _reference(x, labels, student_pred, student_loss)
    assert jnp.allclose(got, want, rtol=1e-5, atol=1e-5), (got, want)

    # other branch (studentLoss below the upper bound)
    small_sl = jnp.float32(1e-4)
    got2 = jax.block_until_ready(
        upper_bound_teacher_loss(x, labels, student_pred, small_sl))
    want2 = _reference(x, labels, student_pred, small_sl)
    assert jnp.allclose(got2, want2, rtol=1e-5, atol=1e-5), (got2, want2)

    # native-dtype (bf16) inputs: DMA'd as bf16, widened to f32 in the kernel
    xb = x.astype(jnp.bfloat16)
    lb = labels.astype(jnp.bfloat16)
    sb = student_pred.astype(jnp.bfloat16)
    got3 = jax.block_until_ready(
        upper_bound_teacher_loss(xb, lb, sb, student_loss))
    want3 = _reference(xb, lb, sb, student_loss)
    assert jnp.allclose(got3, want3, rtol=1e-4, atol=1e-5), (got3, want3)

    # non-8x128-aligned element count (zero-padding path)
    xu = jax.random.normal(ks[4], (2, 3, 15, 17), jnp.float32)
    lu = jax.random.normal(ks[5], (2, 3, 15, 17), jnp.float32)
    su = jax.random.normal(ks[6], (2, 3, 15, 17), jnp.float32)
    got4 = jax.block_until_ready(
        upper_bound_teacher_loss(xu, lu, su, student_loss))
    want4 = _reference(xu, lu, su, student_loss)
    assert jnp.allclose(got4, want4, rtol=1e-5, atol=1e-5), (got4, want4)

    # multi-block + ragged trailing block (rows > MAX_BLOCK_ROWS, in-kernel
    # row mask, no wrapper pad copy)
    xm = jax.random.normal(ks[7], (2, 4, 288, 288), jnp.float32)
    lm = jax.random.normal(ks[8], (2, 4, 288, 288), jnp.float32)
    sm = jax.random.normal(ks[9], (2, 4, 288, 288), jnp.float32)
    got5 = jax.block_until_ready(
        upper_bound_teacher_loss(xm, lm, sm, student_loss))
    want5 = _reference(xm, lm, sm, student_loss)
    assert jnp.allclose(got5, want5, rtol=1e-4, atol=1e-5), (got5, want5)

    print("KERNEL_OK")
</pallas_src>

<mosaic_0001>
module attributes {stable_mosaic.version = 11 : i64} {
  func.func @kernel(%arg0: i32, %arg1: i32, %arg2: memref<16x128xf32, #tpu.memory_space<vmem>>, %arg3: memref<16x128xf32, #tpu.memory_space<vmem>>, %arg4: memref<16x128xf32, #tpu.memory_space<vmem>>, %arg5: memref<8x128xf32, #tpu.memory_space<vmem>>, %arg6: memref<8x128xf32, #tpu.memory_space<vmem>>) attributes {dimension_semantics = [#tpu.dimension_semantics<parallel>, #tpu.dimension_semantics<arbitrary>], iteration_bounds = array<i64: 1, 1>, scalar_prefetch = 0 : i64, scratch_operands = 0 : i64, tpu.core_type = #tpu.core_type<tc>, window_params = [{transform_indices = @transform_0, window_bounds = array<i64: 16, 128>}, {transform_indices = @transform_1, window_bounds = array<i64: 16, 128>}, {transform_indices = @transform_2, window_bounds = array<i64: 16, 128>}, {transform_indices = @transform_3, window_bounds = array<i64: 8, 128>}, {transform_indices = @transform_4, window_bounds = array<i64: 8, 128>}]} {
    %c0_i32 = arith.constant 0 : i32
    %0 = arith.cmpi eq, %arg1, %c0_i32 : i32
    %1 = arith.extui %0 : i1 to i32
    %c0_i32_0 = arith.constant 0 : i32
    %2 = arith.cmpi ne, %1, %c0_i32_0 : i32
    scf.if %2 {
      %cst_15 = arith.constant 0.000000e+00 : f32
      %20 = vector.broadcast %cst_15 : f32 to vector<8x128xf32>
      %c0_16 = arith.constant 0 : index
      %c0_17 = arith.constant 0 : index
      %21 = vector.load %arg5[%c0_16, %c0_17] : memref<8x128xf32, #tpu.memory_space<vmem>>, vector<8x128xf32>
      tpu.vector_store %arg5[%c0_16, %c0_17], %20 {strides = array<i32>} : memref<8x128xf32, #tpu.memory_space<vmem>>, vector<8x128xf32>,
      %cst_18 = arith.constant 0.000000e+00 : f32
      %22 = vector.broadcast %cst_18 : f32 to vector<8x128xf32>
      %c0_19 = arith.constant 0 : index
      %c0_20 = arith.constant 0 : index
      %23 = vector.load %arg6[%c0_19, %c0_20] : memref<8x128xf32, #tpu.memory_space<vmem>>, vector<8x128xf32>
      tpu.vector_store %arg6[%c0_19, %c0_20], %22 {strides = array<i32>} : memref<8x128xf32, #tpu.memory_space<vmem>>, vector<8x128xf32>,
    } else {
    }
    %c0 = arith.constant 0 : index
    %c0_1 = arith.constant 0 : index
    %3 = vector.load %arg2[%c0, %c0_1] : memref<16x128xf32, #tpu.memory_space<vmem>>, vector<16x128xf32>
    %c0_2 = arith.constant 0 : index
    %c0_3 = arith.constant 0 : index
    %4 = vector.load %arg3[%c0_2, %c0_3] : memref<16x128xf32, #tpu.memory_space<vmem>>, vector<16x128xf32>
    %c0_4 = arith.constant 0 : index
    %c0_5 = arith.constant 0 : index
    %5 = vector.load %arg4[%c0_4, %c0_5] : memref<16x128xf32, #tpu.memory_space<vmem>>, vector<16x128xf32>
    %6 = arith.subf %3, %4 : vector<16x128xf32>
    %7 = arith.subf %5, %3 : vector<16x128xf32>
    %8 = arith.mulf %6, %6 : vector<16x128xf32>
    %9 = arith.mulf %7, %7 : vector<16x128xf32>
    %c0_6 = arith.constant 0 : index
    %c0_7 = arith.constant 0 : index
    %10 = vector.load %arg5[%c0_6, %c0_7] : memref<8x128xf32, #tpu.memory_space<vmem>>, vector<8x128xf32>
    %11 = vector.shape_cast %8 : vector<16x128xf32> to vector<2x8x128xf32>
    %cst = arith.constant dense<0.000000e+00> : vector<8x128xf32>
    %12 = vector.multi_reduction <add>, %11, %cst [0] : vector<2x8x128xf32> to vector<8x128xf32>
    %13 = arith.addf %10, %12 : vector<8x128xf32>
    %c0_8 = arith.constant 0 : index
    %c0_9 = arith.constant 0 : index
    %14 = vector.load %arg5[%c0_8, %c0_9] : memref<8x128xf32, #tpu.memory_space<vmem>>, vector<8x128xf32>
    tpu.vector_store %arg5[%c0_8, %c0_9], %13 {strides = array<i32>} : memref<8x128xf32, #tpu.memory_space<vmem>>, vector<8x128xf32>,
    %c0_10 = arith.constant 0 : index
    %c0_11 = arith.constant 0 : index
    %15 = vector.load %arg6[%c0_10, %c0_11] : memref<8x128xf32, #tpu.memory_space<vmem>>, vector<8x128xf32>
    %16 = vector.shape_cast %9 : vector<16x128xf32> to vector<2x8x128xf32>
    %cst_12 = arith.constant dense<0.000000e+00> : vector<8x128xf32>
    %17 = vector.multi_reduction <add>, %16, %cst_12 [0] : vector<2x8x128xf32> to vector<8x128xf32>
    %18 = arith.addf %15, %17 : vector<8x128xf32>
    %c0_13 = arith.constant 0 : index
    %c0_14 = arith.constant 0 : index
    %19 = vector.load %arg6[%c0_13, %c0_14] : memref<8x128xf32, #tpu.memory_space<vmem>>, vector<8x128xf32>
    tpu.vector_store %arg6[%c0_13, %c0_14], %18 {strides = array<i32>} : memref<8x128xf32, #tpu.memory_space<vmem>>, vector<8x128xf32>,
    return
  }
  func.func @transform_0(%arg0: i32, %arg1: i32) -> (i32, i32) {
    %c1_i32 = arith.constant 1 : i32
    %0 = arith.muli %arg0, %c1_i32 : i32
    %1 = arith.addi %0, %arg1 : i32
    %c0_i32 = arith.constant 0 : i32
    %c0_i32_0 = arith.constant 0 : i32
    return %1, %c0_i32 : i32, i32
  }
  func.func @transform_1(%arg0: i32, %arg1: i32) -> (i32, i32) {
    %c1_i32 = arith.constant 1 : i32
    %0 = arith.muli %arg0, %c1_i32 : i32
    %1 = arith.addi %0, %arg1 : i32
    %c0_i32 = arith.constant 0 : i32
    %c0_i32_0 = arith.constant 0 : i32
    return %1, %c0_i32 : i32, i32
  }
  func.func @transform_2(%arg0: i32, %arg1: i32) -> (i32, i32) {
    %c1_i32 = arith.constant 1 : i32
    %0 = arith.muli %arg0, %c1_i32 : i32
    %1 = arith.addi %0, %arg1 : i32
    %c0_i32 = arith.constant 0 : i32
    %c0_i32_0 = arith.constant 0 : i32
    return %1, %c0_i32 : i32, i32
  }
  func.func @transform_3(%arg0: i32, %arg1: i32) -> (i32, i32) {
    %c0_i32 = arith.constant 0 : i32
    %c0_i32_0 = arith.constant 0 : i32
    return %arg0, %c0_i32 : i32, i32
  }
  func.func @transform_4(%arg0: i32, %arg1: i32) -> (i32, i32) {
    %c0_i32 = arith.constant 0 : i32
    %c0_i32_0 = arith.constant 0 : i32
    return %arg0, %c0_i32 : i32, i32
  }
}

</mosaic_0001>

<bundles_post_ra>
// kernel: tpu_custom_call.1
= control target key start
LH: loop header
LB: loop body
LE: loop exit
PB: predicated region body
PF: predicated region fallthrough
CT: control target
= control target key end

     0   :  { %10 = vsyncpa [#allocation3], 0  ;;  %s328_s0 = inlined_call_operand.hbm [shape: f32[16,128], index: 0, kind: input, shape index: {}]   ;;  %s329_s1 = inlined_call_operand.hbm [shape: f32[16,128], index: 1, kind: input, shape index: {}]   ;;  %s330_s2 = inlined_call_operand.hbm [shape: f32[16,128], index: 2, kind: input, shape index: {}]   ;;  %s331_s3 = inlined_call_operand.hbm [shape: f32[8,128], index: 3, kind: output, shape index: {0}]   ;;  %s332_s4 = inlined_call_operand.hbm [shape: f32[8,128], index: 4, kind: output, shape index: {1}]  }
   0x1   :  { %11 = vsyncpa [#allocation6], 0 }
   0x2   :  { %12 = vsyncpa [#allocation4], 0 }
   0x3   :  { %13 = vsyncpa [#allocation10], 0  ;;  %s39_s17 = sshll.u32 %s329_s1, 4  ;;  %s281_s18 = smov [#allocation5]   ;;  %s40_s17 = int_to_ptr.hbm [resolvable:$true] %s39_s17 }
   0x4   :  { %s41_s19 = sshll.u32 %s281_s18, 4  ;;  %s22_s22 = sshll.u32 %s328_s0, 4  ;;  %s42_s19 = int_to_ptr.vmem [resolvable:$true] %s41_s19  ;;  %s23_s22 = int_to_ptr.hbm [resolvable:$true] %s22_s22 }
   0x5   :  { %s282_s23 = smov 128   ;;  %s283_s24 = smov 8  }
   0x6   :  { %47 = dma.hbm_to_vmem [thread:$0]  %s40_s17, 256, %s42_s19, [#allocation6], %s282_s23, %s282_s23, %s283_s24  }
   0x7   :  { %s284_s25 = smov [#allocation2]   ;;  %s56_s29 = sshll.u32 %s330_s2, 4  ;;  %s57_s29 = int_to_ptr.hbm [resolvable:$true] %s56_s29 }
   0x8   :  { %s24_s26 = sshll.u32 %s284_s25, 4  ;;  %s285_s1 = smov [#allocation7]   ;;  %s25_s26 = int_to_ptr.vmem [resolvable:$true] %s24_s26 }
   0x9   :  { %30 = dma.hbm_to_vmem [thread:$0]  %s23_s22, 256, %s25_s26, [#allocation3], %s282_s23, %s282_s23, %s283_s24  }
   0xa   :  { %s58_s30 = sshll.u32 %s285_s1, 4  ;;  %s59_s30 = int_to_ptr.vmem [resolvable:$true] %s58_s30 }
   0xb   :  { %64 = dma.hbm_to_vmem [thread:$0]  %s57_s29, 256, %s59_s30, [#allocation6], %s282_s23, %s282_s23, %s283_s24  }
   0xc   :  { %273 = dma.done.wait [#allocation3], 256  }
   0xd   :  { %274 = vsyncadd [#allocation3], 4294967040 }
   0xe   :  { %275 = dma.done.wait [#allocation6], 512  }
   0xf   :  { %276 = vsyncadd [#allocation6], 4294966784  ;;  %v89_v0 = vld [vmem:[#allocation2] sm:$0xff]  ;;  %v90_v1 = vld [vmem:[#allocation2 + $0x8] sm:$0xff]  ;;  %s286_s0 = smov [#allocation8]   ;;  %s118_s7 = sshll.u32 %s331_s3, 4  ;;  %s119_s7 = int_to_ptr.hbm [resolvable:$true] %s118_s7 }
  0x10   :  { %v91_v2 = vld [vmem:[#allocation5] sm:$0xff]  ;;  %v92_v3 = vld [vmem:[#allocation5 + $0x8] sm:$0xff]  ;;  %v93_v5 = vld [vmem:[#allocation7] sm:$0xff]  ;;  %s116_s2 = sshll.u32 %s286_s0, 4  ;;  %s287_s8 = smov [#allocation9]   ;;  %s117_s2 = int_to_ptr.vmem [resolvable:$true] %s116_s2 }
  0x11   :  { %v95_v4 = vsub.f32 %v89_v0, %v91_v2  ;;  %v94_v6 = vld [vmem:[#allocation7 + $0x8] sm:$0xff]  ;;  %v96_v7 = vsub.f32 %v90_v1, %v92_v3  ;;  %v97_v8 = vsub.f32 %v93_v5, %v89_v0  ;;  %s127_s9 = sshll.u32 %s287_s8, 4  ;;  %s129_s12 = sshll.u32 %s332_s4, 4  ;;  %s128_s9 = int_to_ptr.vmem [resolvable:$true] %s127_s9  ;;  %s130_s12 = int_to_ptr.hbm [resolvable:$true] %s129_s12 }
  0x12   :  { %v98_v9 = vsub.f32 %v94_v6, %v90_v1 }
  0x13   :  { %v99_v10 = vmul.f32 %v95_v4, %v95_v4  ;;  %v100_v11 = vmul.f32 %v96_v7, %v96_v7  ;;  %v101_v12 = vmul.f32 %v97_v8, %v97_v8 }
  0x14   :  { %v102_v13 = vmul.f32 %v98_v9, %v98_v9 }
  0x15   :  { %v104_v14 = vadd.f32 %v100_v11, %v99_v10 }
  0x16   :  { %v108_v15 = vadd.f32 %v102_v13, %v101_v12 }
  0x17   :  { %106 = vst [vmem:[#allocation8] sm:$0xff] %v104_v14 }
  0x18   :  { %110 = vst [vmem:[#allocation9] sm:$0xff] %v108_v15  ;;  %121 = dma.vmem_to_hbm [thread:$0]  %s117_s2, 128, %s119_s7, [#allocation4]  }
  0x19   :  { %132 = dma.vmem_to_hbm [thread:$0]  %s128_s9, 128, %s130_s12, [#allocation10]  }
  0x1a   :  { %277 = dma.done.wait [#allocation4], 128  }
  0x1b   :  { %278 = vsyncadd [#allocation4], 4294967168 }
  0x1c   :  { %279 = dma.done.wait [#allocation10], 128  }
  0x1d   :  { %280 = vsyncadd [#allocation10], 4294967168 }
  0x1e   :  { %141 = vsyncpa [#allocation3], 1 }
  0x1f   :  { %142 = vsyncpa [#allocation6], 1 }
  0x20   :  { %143 = vsyncpa [#allocation4], 1 }
  0x21   :  { %144 = vsyncpa [#allocation10], 1 }

</bundles_post_ra>
